<compile_context>
chip_gen: v7x
topology: tpu7x:2x2x1
jax: 0.10.0
libtpu: 0.0.40
codegen_flags: <defaults>
</compile_context>

<pallas_src>
import jax
import jax.numpy as jnp
import numpy as np
from jax.experimental import pallas as pl
from jax.experimental.pallas import tpu as pltpu

KH = 7
KW = 7
PAD = 3


def conv_relu_kernel(xp_ref, w_ref, b_ref, o_ref):
    # xp_ref: (1, Hp, W*Cin)      f32  vertically padded, lane-dense input rows
    # w_ref:  (KH, W*Cin, W*Cout) bf16 banded weights (horiz. padding folded in)
    # b_ref:  (1, W*Cout)         f32  bias tiled across the W positions
    # o_ref:  (1, H, W*Cout)      f32  lane-dense output rows
    H = o_ref.shape[1]
    WCout = o_ref.shape[2]

    xp = xp_ref[0]                                        # (Hp, W*Cin) f32
    acc = jnp.zeros((H, WCout), dtype=jnp.float32)
    for kh in range(KH):                                  # unrolled: 7 MXU matmuls
        xin = xp[kh:kh + H, :].astype(jnp.bfloat16)       # contiguous (H, W*Cin) slab
        acc = acc + jnp.dot(xin, w_ref[kh],
                            preferred_element_type=jnp.float32)

    out = jnp.maximum(acc + b_ref[...], 0.0)              # bias + ReLU
    o_ref[0] = out.astype(o_ref.dtype)


def prepare_banded_params(weight_oihw, bias, W):
    """One-time parameter prep: banded bf16 weights + lane-dense bias.

    B[kh, wi*Cin + ci, wo*Cout + co] = weight[co, ci, kh, kw] where
    wi = wo + kw - PAD (and 0 outside [0, W)), i.e. the horizontal 'same'
    padding is encoded in the band structure.
    """
    Cout, Cin, _, _ = weight_oihw.shape
    w_t = jnp.transpose(weight_oihw, (2, 3, 1, 0))        # (KH, KW, Cin, Cout)
    wi = jnp.arange(W)[:, None]                           # input column index
    wo = jnp.arange(W)[None, :]                           # output column index
    B4 = jnp.zeros((KH, W, Cin, W, Cout), jnp.float32)
    for kw in range(KW):
        sel = (wi == wo + (kw - PAD)).astype(jnp.float32)  # (W, W) band selector
        B4 = B4 + jnp.einsum("iw,kco->kicwo", sel, w_t[:, kw])
    B = B4.reshape(KH, W * Cin, W * Cout).astype(jnp.bfloat16)
    b_wide = jnp.tile(bias, W).reshape(1, W * Cout).astype(jnp.float32)
    return B, b_wide


def conv2d_relu_lane_dense(xp, B, b_wide, H):
    """Hot path: xp is the vertically-padded lane-dense input (N, H+2*PAD, W*Cin)."""
    N, Hp, WCin = xp.shape
    WCout = B.shape[2]
    return pl.pallas_call(
        conv_relu_kernel,
        out_shape=jax.ShapeDtypeStruct((N, H, WCout), jnp.float32),
        grid_spec=pltpu.PrefetchScalarGridSpec(
            num_scalar_prefetch=0,
            grid=(N,),
            in_specs=[
                pl.BlockSpec((1, Hp, WCin), lambda n: (n, 0, 0)),
                pl.BlockSpec((KH, WCin, WCout), lambda n: (0, 0, 0)),
                pl.BlockSpec((1, WCout), lambda n: (0, 0)),
            ],
            out_specs=pl.BlockSpec((1, H, WCout), lambda n: (n, 0, 0)),
        ),
        compiler_params=pltpu.CompilerParams(
            dimension_semantics=("parallel",)),
    )(xp, B, b_wide)


def conv2d_relu_nchw(x_nchw, weight_oihw, bias):
    """PyTorch-layout compatibility wrapper (NCHW in / NCHW out)."""
    N, Cin, H, W = x_nchw.shape
    Cout = weight_oihw.shape[0]
    # Parameter prep (in practice done once, outside the per-step hot path).
    B, b_wide = prepare_banded_params(weight_oihw, bias, W)
    # NCHW -> lane-dense (N, H, W*Cin); pad only the H axis (W padding is
    # folded into the banded weights).
    x_ld = jnp.transpose(x_nchw, (0, 2, 3, 1)).reshape(N, H, W * Cin)
    xp = jnp.pad(x_ld, ((0, 0), (PAD, PAD), (0, 0)))
    out_ld = conv2d_relu_lane_dense(xp, B, b_wide, H)
    # lane-dense -> NCHW (match PyTorch output layout).
    return jnp.transpose(out_ld.reshape(N, H, W, Cout), (0, 3, 1, 2))
    # TODO(synk): if H/W are scaled to real image sizes (e.g. 64x64+), tile the
    # H axis with an extra grid dimension and budget blocks against v7x's 64 MiB VMEM.


if __name__ == "__main__":
    # Small shapes consistent with the module: channels fixed at 16 by the conv.
    N, C, H, W = 2, 16, 16, 16

    key = jax.random.PRNGKey(0)
    kx, kw_, kb = jax.random.split(key, 3)
    x = jax.random.normal(kx, (N, C, H, W), dtype=jnp.float32)
    fan_in = C * KH * KW
    weight = jax.random.normal(kw_, (16, C, KH, KW), dtype=jnp.float32) / np.sqrt(fan_in)
    bias = jax.random.normal(kb, (16,), dtype=jnp.float32) * 0.1

    out = jax.jit(conv2d_relu_nchw)(x, weight, bias)
    out = jax.block_until_ready(out)

    # Pure-JAX references.
    def conv_ref(xr, wr):
        y = jax.lax.conv_general_dilated(
            xr, wr, window_strides=(1, 1), padding=((PAD, PAD), (PAD, PAD)),
            dimension_numbers=("NCHW", "OIHW", "NCHW"),
            precision=jax.lax.Precision.HIGHEST)
        return jnp.maximum(y + bias[None, :, None, None], 0.0)

    # (1) Exact-structure check vs a reference with the same bf16 operand
    #     quantization (kernel accumulates in f32).
    xq = x.astype(jnp.bfloat16).astype(jnp.float32)
    wq = weight.astype(jnp.bfloat16).astype(jnp.float32)
    ref_bf = conv_ref(xq, wq)
    np.testing.assert_allclose(np.asarray(out), np.asarray(ref_bf),
                               rtol=5e-4, atol=5e-4)

    # (2) Loose check vs the full-f32 reference (bounds bf16 quantization error).
    ref_f32 = conv_ref(x, weight)
    np.testing.assert_allclose(np.asarray(out), np.asarray(ref_f32),
                               rtol=5e-2, atol=5e-2)

    print("KERNEL_OK")
</pallas_src>

<mosaic_0001>
module attributes {stable_mosaic.version = 11 : i64} {
  func.func @conv_relu_kernel(%arg0: i32, %arg1: memref<1x22x256xf32, #tpu.memory_space<vmem>>, %arg2: memref<7x256x256xbf16, #tpu.memory_space<vmem>>, %arg3: memref<1x256xf32, #tpu.memory_space<vmem>>, %arg4: memref<1x16x256xf32, #tpu.memory_space<vmem>>) attributes {dimension_semantics = [#tpu.dimension_semantics<parallel>], iteration_bounds = array<i64: 2>, scalar_prefetch = 0 : i64, scratch_operands = 0 : i64, tpu.core_type = #tpu.core_type<tc>, window_params = [{transform_indices = @transform_0, window_bounds = array<i64: 1, 22, 256>}, {pipeline_mode = #tpu.pipeline_mode<synchronous>, transform_indices = @transform_1, window_bounds = array<i64: 7, 256, 256>}, {pipeline_mode = #tpu.pipeline_mode<synchronous>, transform_indices = @transform_2, window_bounds = array<i64: 1, 256>}, {transform_indices = @transform_3, window_bounds = array<i64: 1, 16, 256>}]} {
    %c0 = arith.constant 0 : index
    %c0_0 = arith.constant 0 : index
    %c0_1 = arith.constant 0 : index
    %0 = vector.load %arg1[%c0, %c0_0, %c0_1] : memref<1x22x256xf32, #tpu.memory_space<vmem>>, vector<1x22x256xf32>
    %1 = vector.shape_cast %0 : vector<1x22x256xf32> to vector<22x256xf32>
    %cst = arith.constant 0.000000e+00 : f32
    %2 = vector.broadcast %cst : f32 to vector<16x256xf32>
    %3 = vector.extract_strided_slice %1 {offsets = [0, 0], sizes = [16, 256], strides = [1, 1]} : vector<22x256xf32> to vector<16x256xf32>
    %4 = arith.truncf %3 : vector<16x256xf32> to vector<16x256xbf16>
    %c0_2 = arith.constant 0 : index
    %c0_3 = arith.constant 0 : index
    %c0_4 = arith.constant 0 : index
    %5 = vector.load %arg2[%c0_2, %c0_3, %c0_4] : memref<7x256x256xbf16, #tpu.memory_space<vmem>>, vector<1x256x256xbf16>
    %6 = vector.shape_cast %5 : vector<1x256x256xbf16> to vector<256x256xbf16>
    %cst_5 = arith.constant dense<0.000000e+00> : vector<16x256xf32>
    %7 = tpu.matmul %4, %6, %cst_5 {dimension_numbers = #tpu.dot_dimension_numbers<[1], [0], [0], [1], [0, 0, 1, 1], [], []>} : vector<16x256xbf16>, vector<256x256xbf16>, vector<16x256xf32> -> vector<16x256xf32>
    %8 = arith.addf %2, %7 : vector<16x256xf32>
    %9 = vector.extract_strided_slice %1 {offsets = [1, 0], sizes = [16, 256], strides = [1, 1]} : vector<22x256xf32> to vector<16x256xf32>
    %10 = arith.truncf %9 : vector<16x256xf32> to vector<16x256xbf16>
    %c1 = arith.constant 1 : index
    %c0_6 = arith.constant 0 : index
    %c0_7 = arith.constant 0 : index
    %11 = vector.load %arg2[%c1, %c0_6, %c0_7] : memref<7x256x256xbf16, #tpu.memory_space<vmem>>, vector<1x256x256xbf16>
    %12 = vector.shape_cast %11 : vector<1x256x256xbf16> to vector<256x256xbf16>
    %cst_8 = arith.constant dense<0.000000e+00> : vector<16x256xf32>
    %13 = tpu.matmul %10, %12, %cst_8 {dimension_numbers = #tpu.dot_dimension_numbers<[1], [0], [0], [1], [0, 0, 1, 1], [], []>} : vector<16x256xbf16>, vector<256x256xbf16>, vector<16x256xf32> -> vector<16x256xf32>
    %14 = arith.addf %8, %13 : vector<16x256xf32>
    %15 = vector.extract_strided_slice %1 {offsets = [2, 0], sizes = [16, 256], strides = [1, 1]} : vector<22x256xf32> to vector<16x256xf32>
    %16 = arith.truncf %15 : vector<16x256xf32> to vector<16x256xbf16>
    %c2 = arith.constant 2 : index
    %c0_9 = arith.constant 0 : index
    %c0_10 = arith.constant 0 : index
    %17 = vector.load %arg2[%c2, %c0_9, %c0_10] : memref<7x256x256xbf16, #tpu.memory_space<vmem>>, vector<1x256x256xbf16>
    %18 = vector.shape_cast %17 : vector<1x256x256xbf16> to vector<256x256xbf16>
    %cst_11 = arith.constant dense<0.000000e+00> : vector<16x256xf32>
    %19 = tpu.matmul %16, %18, %cst_11 {dimension_numbers = #tpu.dot_dimension_numbers<[1], [0], [0], [1], [0, 0, 1, 1], [], []>} : vector<16x256xbf16>, vector<256x256xbf16>, vector<16x256xf32> -> vector<16x256xf32>
    %20 = arith.addf %14, %19 : vector<16x256xf32>
    %21 = vector.extract_strided_slice %1 {offsets = [3, 0], sizes = [16, 256], strides = [1, 1]} : vector<22x256xf32> to vector<16x256xf32>
    %22 = arith.truncf %21 : vector<16x256xf32> to vector<16x256xbf16>
    %c3 = arith.constant 3 : index
    %c0_12 = arith.constant 0 : index
    %c0_13 = arith.constant 0 : index
    %23 = vector.load %arg2[%c3, %c0_12, %c0_13] : memref<7x256x256xbf16, #tpu.memory_space<vmem>>, vector<1x256x256xbf16>
    %24 = vector.shape_cast %23 : vector<1x256x256xbf16> to vector<256x256xbf16>
    %cst_14 = arith.constant dense<0.000000e+00> : vector<16x256xf32>
    %25 = tpu.matmul %22, %24, %cst_14 {dimension_numbers = #tpu.dot_dimension_numbers<[1], [0], [0], [1], [0, 0, 1, 1], [], []>} : vector<16x256xbf16>, vector<256x256xbf16>, vector<16x256xf32> -> vector<16x256xf32>
    %26 = arith.addf %20, %25 : vector<16x256xf32>
    %27 = vector.extract_strided_slice %1 {offsets = [4, 0], sizes = [16, 256], strides = [1, 1]} : vector<22x256xf32> to vector<16x256xf32>
    %28 = arith.truncf %27 : vector<16x256xf32> to vector<16x256xbf16>
    %c4 = arith.constant 4 : index
    %c0_15 = arith.constant 0 : index
    %c0_16 = arith.constant 0 : index
    %29 = vector.load %arg2[%c4, %c0_15, %c0_16] : memref<7x256x256xbf16, #tpu.memory_space<vmem>>, vector<1x256x256xbf16>
    %30 = vector.shape_cast %29 : vector<1x256x256xbf16> to vector<256x256xbf16>
    %cst_17 = arith.constant dense<0.000000e+00> : vector<16x256xf32>
    %31 = tpu.matmul %28, %30, %cst_17 {dimension_numbers = #tpu.dot_dimension_numbers<[1], [0], [0], [1], [0, 0, 1, 1], [], []>} : vector<16x256xbf16>, vector<256x256xbf16>, vector<16x256xf32> -> vector<16x256xf32>
    %32 = arith.addf %26, %31 : vector<16x256xf32>
    %33 = vector.extract_strided_slice %1 {offsets = [5, 0], sizes = [16, 256], strides = [1, 1]} : vector<22x256xf32> to vector<16x256xf32>
    %34 = arith.truncf %33 : vector<16x256xf32> to vector<16x256xbf16>
    %c5 = arith.constant 5 : index
    %c0_18 = arith.constant 0 : index
    %c0_19 = arith.constant 0 : index
    %35 = vector.load %arg2[%c5, %c0_18, %c0_19] : memref<7x256x256xbf16, #tpu.memory_space<vmem>>, vector<1x256x256xbf16>
    %36 = vector.shape_cast %35 : vector<1x256x256xbf16> to vector<256x256xbf16>
    %cst_20 = arith.constant dense<0.000000e+00> : vector<16x256xf32>
    %37 = tpu.matmul %34, %36, %cst_20 {dimension_numbers = #tpu.dot_dimension_numbers<[1], [0], [0], [1], [0, 0, 1, 1], [], []>} : vector<16x256xbf16>, vector<256x256xbf16>, vector<16x256xf32> -> vector<16x256xf32>
    %38 = arith.addf %32, %37 : vector<16x256xf32>
    %39 = vector.extract_strided_slice %1 {offsets = [6, 0], sizes = [16, 256], strides = [1, 1]} : vector<22x256xf32> to vector<16x256xf32>
    %40 = arith.truncf %39 : vector<16x256xf32> to vector<16x256xbf16>
    %c6 = arith.constant 6 : index
    %c0_21 = arith.constant 0 : index
    %c0_22 = arith.constant 0 : index
    %41 = vector.load %arg2[%c6, %c0_21, %c0_22] : memref<7x256x256xbf16, #tpu.memory_space<vmem>>, vector<1x256x256xbf16>
    %42 = vector.shape_cast %41 : vector<1x256x256xbf16> to vector<256x256xbf16>
    %cst_23 = arith.constant dense<0.000000e+00> : vector<16x256xf32>
    %43 = tpu.matmul %40, %42, %cst_23 {dimension_numbers = #tpu.dot_dimension_numbers<[1], [0], [0], [1], [0, 0, 1, 1], [], []>} : vector<16x256xbf16>, vector<256x256xbf16>, vector<16x256xf32> -> vector<16x256xf32>
    %44 = arith.addf %38, %43 : vector<16x256xf32>
    %c0_24 = arith.constant 0 : index
    %c0_25 = arith.constant 0 : index
    %45 = vector.load %arg3[%c0_24, %c0_25] : memref<1x256xf32, #tpu.memory_space<vmem>>, vector<1x256xf32>
    %46 = vector.broadcast %45 : vector<1x256xf32> to vector<16x256xf32>
    %47 = arith.addf %44, %46 : vector<16x256xf32>
    %cst_26 = arith.constant 0.000000e+00 : f32
    %48 = vector.broadcast %cst_26 : f32 to vector<16x256xf32>
    %49 = arith.maximumf %47, %48 : vector<16x256xf32>
    %c0_27 = arith.constant 0 : index
    %c0_28 = arith.constant 0 : index
    %c0_29 = arith.constant 0 : index
    %50 = vector.load %arg4[%c0_27, %c0_28, %c0_29] : memref<1x16x256xf32, #tpu.memory_space<vmem>>, vector<1x16x256xf32>
    %51 = vector.shape_cast %50 : vector<1x16x256xf32> to vector<16x256xf32>
    %52 = vector.shape_cast %49 : vector<16x256xf32> to vector<1x16x256xf32>
    tpu.vector_store %arg4[%c0_27, %c0_28, %c0_29], %52 {strides = array<i32>} : memref<1x16x256xf32, #tpu.memory_space<vmem>>, vector<1x16x256xf32>,
    return
  }
  func.func @transform_0(%arg0: i32) -> (i32, i32, i32) {
    %c0_i32 = arith.constant 0 : i32
    %c0_i32_0 = arith.constant 0 : i32
    %c0_i32_1 = arith.constant 0 : i32
    return %arg0, %c0_i32, %c0_i32_0 : i32, i32, i32
  }
  func.func @transform_1(%arg0: i32) -> (i32, i32, i32) {
    %c0_i32 = arith.constant 0 : i32
    %c0_i32_0 = arith.constant 0 : i32
    %c0_i32_1 = arith.constant 0 : i32
    %c0_i32_2 = arith.constant 0 : i32
    return %c0_i32, %c0_i32_0, %c0_i32_1 : i32, i32, i32
  }
  func.func @transform_2(%arg0: i32) -> (i32, i32) {
    %c0_i32 = arith.constant 0 : i32
    %c0_i32_0 = arith.constant 0 : i32
    %c0_i32_1 = arith.constant 0 : i32
    return %c0_i32, %c0_i32_0 : i32, i32
  }
  func.func @transform_3(%arg0: i32) -> (i32, i32, i32) {
    %c0_i32 = arith.constant 0 : i32
    %c0_i32_0 = arith.constant 0 : i32
    %c0_i32_1 = arith.constant 0 : i32
    return %arg0, %c0_i32, %c0_i32_0 : i32, i32, i32
  }
}

</mosaic_0001>

<bundles_post_ra>
// kernel: tile.8
= control target key start
LH: loop header
LB: loop body
LE: loop exit
PB: predicated region body
PF: predicated region fallthrough
CT: control target
= control target key end

     0   :  { %s28_s0 = inlined_call_operand.vmem [shape: f32[16], index: 0, kind: input, shape index: {}]   ;;  %s29_s1 = inlined_call_operand.vmem [shape: f32[16,16], index: 1, kind: output, shape index: {}]  }
   0x1   :  { %v4_v0 = vld [vmem:[%s28_s0] ss:$0 sm:$0xff] }
   0x2   :  { %5 = vst [vmem:[%s29_s1] sm:$0xff] %v4_v0  ;;  %8 = vst [vmem:[%s29_s1 + $0x8] sm:$0xff] %v4_v0 }

// kernel: tile.9
= control target key start
LH: loop header
LB: loop body
LE: loop exit
PB: predicated region body
PF: predicated region fallthrough
CT: control target
= control target key end

     0   :  { %s7_s6 = smov 3  ;;  %s21_s9 = smov 3  ;;  %vm4_vm0 = vcmask 130048   ;;  %vm11_vm1 = vcmask 1048448   ;;  %vm18_vm2 = vcmask 917248   ;;  %vm25_vm3 = vcmask 786048   ;;  %s128_s0 = inlined_call_operand.vmem [shape: f32[16,16], index: 0, kind: input, shape index: {}]   ;;  %s129_s1 = inlined_call_operand.vmem [shape: f32[1,256], index: 1, kind: output, shape index: {}]  }
   0x1   :  { %v66_v0 = vld [vmem:[%s128_s0 + $0x7] ss:$8 sm:%s7_s6]   ;;  %s81_s10 = smov 112   ;;  %v68_v1 = vld [vmem:[%s128_s0 + $0x5] ss:$8 sm:%s21_s9]   ;;  %s14_s13 = smov 3 }
   0x2   :  { %9 = vrot.lane.b32.xlu0 %v66_v0, %s81_s10  ;;  %s82_s14 = smov 80   ;;  %v67_v2 = vld [vmem:[%s128_s0 + $0x6] ss:$8 sm:%s14_s13]   ;;  %s28_s17 = smov 3  ;;  %vm32_vm4 = vcmask 654848   ;;  %vm39_vm5 = vcmask 523648  }
   0x3   :  { %23 = vrot.lane.b32.xlu1 %v68_v1, %s82_s14  ;;  %v69_v3 = vld [vmem:[%s128_s0 + $0x4] ss:$8 sm:%s28_s17]   ;;  %s35_s20 = smov 3  ;;  %s42_s21 = smov 3  ;;  %vm46_vm6 = vcmask 392448   ;;  %vm53_vm7 = vcmask 261248  }
   0x4   :  { %s83_s22 = smov 96   ;;  %s84_s23 = smov 64   ;;  %v70_v4 = vld [vmem:[%s128_s0 + $0x3] ss:$8 sm:%s35_s20]   ;;  %v71_v5 = vld [vmem:[%s128_s0 + $0x2] ss:$8 sm:%s42_s21]  }
   0x5   :  { %s2_s26 = smov 3  ;;  %s49_s29 = smov 3 }
   0x6   :  { %16 = vrot.lane.b32.xlu0 %v67_v2, %s83_s22  ;;  %v3_v6 = vld [vmem:[%s128_s0] ss:$8 sm:%s2_s26]   ;;  %s85_s3 = smov 48   ;;  %s86_s4 = smov 32  }
   0x7   :  { %30 = vrot.lane.b32.xlu1 %v69_v3, %s84_s23  ;;  %5 = vst.msk [vmem:[#allocation0] ss:$8 sm:$0x3] %vm4_vm0, %v3_v6   ;;  %v72_v7 = vld [vmem:[%s128_s0 + $0x1] ss:$8 sm:%s49_s29]   ;;  %s87_s0 = smov 16  }
   0xa   :  { %37 = vrot.lane.b32.xlu0 %v70_v4, %s85_s3 }
   0xb   :  { %44 = vrot.lane.b32.xlu1 %v71_v5, %s86_s4 }
   0xe   :  { %51 = vrot.lane.b32.xlu0 %v72_v7, %s87_s0 }
  0x74   :  { %v10_v8 = vpop.permute.xlu0 %9  }
  0x75   :  { %12 = vst.msk [vmem:[#allocation0] ss:$8 sm:$0x3] %vm11_vm1, %v10_v8   ;;  %v24_v9 = vpop.permute.xlu1 %23  }
  0x78   :  { %v17_v10 = vpop.permute.xlu0 %16  }
  0x79   :  { %19 = vst.msk [vmem:[#allocation0] ss:$8 sm:$0x3] %vm18_vm2, %v17_v10   ;;  %v31_v11 = vpop.permute.xlu1 %30  }
  0x7a   :  { %26 = vst.msk [vmem:[#allocation0] ss:$8 sm:$0x3] %vm25_vm3, %v24_v9  }
  0x7b   :  { %33 = vst.msk [vmem:[#allocation0] ss:$8 sm:$0x3] %vm32_vm4, %v31_v11  }
  0x7c   :  { %v38_v12 = vpop.permute.xlu0 %37  }
  0x7d   :  { %40 = vst.msk [vmem:[#allocation0] ss:$8 sm:$0x3] %vm39_vm5, %v38_v12   ;;  %v45_v13 = vpop.permute.xlu1 %44  }
  0x7e   :  { %47 = vst.msk [vmem:[#allocation0] ss:$8 sm:$0x3] %vm46_vm6, %v45_v13  }
  0x80   :  { %v52_v14 = vpop.permute.xlu0 %51  }
  0x81   :  { %54 = vst.msk [vmem:[#allocation0] ss:$8 sm:$0x3] %vm53_vm7, %v52_v14  }
  0x88   :  { %v58_v15 = vld [vmem:[#allocation0] sm:$0x1]  ;;  %v62_v16 = vld [vmem:[#allocation0 + $0x8] sm:$0x1] }
  0x89   :  { %60 = vst [vmem:[%s129_s1] sm:$0x1] %v58_v15  ;;  %73 = vst [vmem:[%s129_s1 + $0x1] sm:$0x1] %v62_v16 }

// kernel: conv2d_relu_nchw.1
= control target key start
LH: loop header
LB: loop body
LE: loop exit
PB: predicated region body
PF: predicated region fallthrough
CT: control target
= control target key end

     0   :  { %s2851_s12 = smov 0   ;;  %s3637_s0 = inlined_call_operand.vmem [shape: f32[2,22,256], index: 0, kind: input, shape index: {}]   ;;  %s3638_s1 = inlined_call_operand.vmem [shape: bf16[7,256,256], index: 1, kind: input, shape index: {}]   ;;  %s3639_s2 = inlined_call_operand.vmem [shape: f32[1,256], index: 2, kind: input, shape index: {}]   ;;  %s3640_s3 = inlined_call_operand.vmem [shape: f32[2,16,256], index: 3, kind: output, shape index: {}]  }
   0x1 LB: > { %s2027_s13 = sadd.s32 4294967295, %s2829_s12   ;;  %p2031_p0 = scmp.ge.s32.totalorder %s2829_s12, 1  ;;  %s2829_s12 = sphi %s2851_s12, %s13_s12  }
   0x2   : > { %p137_p1 = scmp.lt.s32.totalorder %s2829_s12, 3 }
   0x4   : > { %p138_p2 = pnand %p2031_p0, %p137_p1 }
   0x5   : > { %v2487_v0 = vld [vmem:[%s3638_s1 + $0x104] ss:$8 sps:$4 sm:$0xff] (!%p138_p2)   ;;  %v2491_v2 = vld [vmem:[%s3638_s1 + $0x100] ss:$8 sps:$4 sm:$0xff] (!%p138_p2)   ;;  %v2493_v4 = vld [vmem:[%s3638_s1 + $0x114] ss:$8 sps:$4 sm:$0xff] (!%p138_p2)  }
   0x6   : > { %141 = sbr.rel (%p138_p2) target bundleno = 485 (0x1e5), region = 32  ;;  %v2489_v1 = vld [vmem:[%s3638_s1 + $0x304] ss:$8 sps:$4 sm:$0xff] (!%p138_p2)   ;;  %433 = vmatprep.subr.bf16.mxu1 (!%p138_p2), %v2487_v0  ;;  %v2492_v3 = vld [vmem:[%s3638_s1 + $0x300] ss:$8 sps:$4 sm:$0xff] (!%p138_p2)   ;;  %p161_p3 = scmp.lt.s32.totalorder (!%p138_p2), %s2027_s13, 1 }
   0x7   : > { %1146 = vmatprep.subr.bf16.mxu0 (!%p138_p2), %v2489_v1  ;;  %434 = vmatpush1.bf16.msra.mxu1 (!%p138_p2), %v2491_v2  ;;  %v2495_v5 = vld [vmem:[%s3638_s1 + $0x314] ss:$8 sps:$4 sm:$0xff] (!%p138_p2)   ;;  %v2497_v6 = vld [vmem:[%s3638_s1 + $0x110] ss:$8 sps:$4 sm:$0xff] (!%p138_p2)   ;;  %v2499_v8 = vld [vmem:[%s3638_s1 + $0x124] ss:$8 sps:$4 sm:$0xff] (!%p138_p2)  }
   0x8   : > { %1147 = vmatpush1.bf16.msra.mxu0 (!%p138_p2), %v2492_v3  ;;  %435 = vmatprep.subr.bf16.mxu1 (!%p138_p2), %v2493_v4  ;;  %v2498_v7 = vld [vmem:[%s3638_s1 + $0x310] ss:$8 sps:$4 sm:$0xff] (!%p138_p2)   ;;  %v2501_v9 = vld [vmem:[%s3638_s1 + $0x324] ss:$8 sps:$4 sm:$0xff] (!%p138_p2)   ;;  %v2503_v10 = vld [vmem:[%s3638_s1 + $0x120] ss:$8 sps:$4 sm:$0xff] (!%p138_p2)  }
   0x9   : > { %1148 = vmatprep.subr.bf16.mxu0 (!%p138_p2), %v2495_v5  ;;  %v2504_v11 = vld [vmem:[%s3638_s1 + $0x320] ss:$8 sps:$4 sm:$0xff] (!%p138_p2)   ;;  %v2505_v12 = vld [vmem:[%s3638_s1 + $0x134] ss:$8 sps:$4 sm:$0xff] (!%p138_p2)   ;;  %v2509_v14 = vld [vmem:[%s3638_s1 + $0x130] ss:$8 sps:$4 sm:$0xff] (!%p138_p2)  }
   0xa   : > { %v2507_v13 = vld [vmem:[%s3638_s1 + $0x334] ss:$8 sps:$4 sm:$0xff] (!%p138_p2)   ;;  %v2510_v15 = vld [vmem:[%s3638_s1 + $0x330] ss:$8 sps:$4 sm:$0xff] (!%p138_p2)   ;;  %v2511_v16 = vld [vmem:[%s3638_s1 + $0x144] ss:$8 sps:$4 sm:$0xff] (!%p138_p2)  }
   0xb   : > { %436 = vmatpush1.bf16.msra.mxu1 (!%p138_p2), %v2497_v6  ;;  %v2513_v17 = vld [vmem:[%s3638_s1 + $0x344] ss:$8 sps:$4 sm:$0xff] (!%p138_p2)   ;;  %v2515_v18 = vld [vmem:[%s3638_s1 + $0x140] ss:$8 sps:$4 sm:$0xff] (!%p138_p2)   ;;  %v2517_v20 = vld [vmem:[%s3638_s1 + $0x154] ss:$8 sps:$4 sm:$0xff] (!%p138_p2)  }
   0xc   : > { %1149 = vmatpush1.bf16.msra.mxu0 (!%p138_p2), %v2498_v7  ;;  %437 = vmatprep.subr.bf16.mxu1 (!%p138_p2), %v2499_v8  ;;  %v2516_v19 = vld [vmem:[%s3638_s1 + $0x340] ss:$8 sps:$4 sm:$0xff] (!%p138_p2)   ;;  %v2519_v21 = vld [vmem:[%s3638_s1 + $0x354] ss:$8 sps:$4 sm:$0xff] (!%p138_p2)   ;;  %v2521_v22 = vld [vmem:[%s3638_s1 + $0x150] ss:$8 sps:$4 sm:$0xff] (!%p138_p2)  }
   0xd   : > { %1150 = vmatprep.subr.bf16.mxu0 %v2501_v9  ;;  %v2522_v23 = vld [vmem:[%s3638_s1 + $0x350] ss:$8 sps:$4 sm:$0xff]   ;;  %v2523_v24 = vld [vmem:[%s3638_s1 + $0x164] ss:$8 sps:$4 sm:$0xff]   ;;  %v2527_v26 = vld [vmem:[%s3638_s1 + $0x160] ss:$8 sps:$4 sm:$0xff]  }
   0xe   : > { %v2525_v25 = vld [vmem:[%s3638_s1 + $0x364] ss:$8 sps:$4 sm:$0xff]   ;;  %v2528_v27 = vld [vmem:[%s3638_s1 + $0x360] ss:$8 sps:$4 sm:$0xff]   ;;  %v2529_v28 = vld [vmem:[%s3638_s1 + $0x174] ss:$8 sps:$4 sm:$0xff]  }
   0xf   : > { %438 = vmatpush1.bf16.msra.mxu1 %v2503_v10  ;;  %v2531_v29 = vld [vmem:[%s3638_s1 + $0x374] ss:$8 sps:$4 sm:$0xff]   ;;  %v2533_v30 = vld [vmem:[%s3638_s1 + $0x170] ss:$8 sps:$4 sm:$0xff]   ;;  %v2535_v32 = vld [vmem:[%s3638_s1 + $0x184] ss:$8 sps:$4 sm:$0xff]  }
  0x10   : > { %1151 = vmatpush1.bf16.msra.mxu0 %v2504_v11  ;;  %439 = vmatprep.subr.bf16.mxu1 %v2505_v12  ;;  %v2534_v31 = vld [vmem:[%s3638_s1 + $0x370] ss:$8 sps:$4 sm:$0xff]   ;;  %v2537_v33 = vld [vmem:[%s3638_s1 + $0x384] ss:$8 sps:$4 sm:$0xff]   ;;  %v2539_v34 = vld [vmem:[%s3638_s1 + $0x180] ss:$8 sps:$4 sm:$0xff]  }
  0x11   : > { %1152 = vmatprep.subr.bf16.mxu0 %v2507_v13  ;;  %v2540_v35 = vld [vmem:[%s3638_s1 + $0x380] ss:$8 sps:$4 sm:$0xff]   ;;  %s3642_s13 = smov (!%p161_p3, %s2027_s13), 1  ;;  %v2541_v36 = vld [vmem:[%s3638_s1 + $0x194] ss:$8 sps:$4 sm:$0xff]   ;;  %vm1226_vm2 = vcmask 1045504  }
  0x12   : > { %v2543_v37 = vld [vmem:[%s3638_s1 + $0x394] ss:$8 sps:$4 sm:$0xff]   ;;  %v2545_v38 = vld [vmem:[%s3638_s1 + $0x190] ss:$8 sps:$4 sm:$0xff]   ;;  %s2478_s17 = smul.u32 48, %s3642_s13  ;;  %vm716_vm4 = vcmask 1046528  }
  0x13   : > { %440 = vmatpush1.bf16.msra.mxu1 %v2509_v14  ;;  %v2546_v39 = vld [vmem:[%s3638_s1 + $0x390] ss:$8 sps:$4 sm:$0xff]   ;;  %v2547_v40 = vld [vmem:[%s3638_s1 + $0x1a4] ss:$8 sps:$4 sm:$0xff]   ;;  %v2551_v42 = vld [vmem:[%s3638_s1 + $0x1a0] ss:$8 sps:$4 sm:$0xff]  }
  0x14   : > { %1153 = vmatpush1.bf16.msra.mxu0 %v2510_v15  ;;  %441 = vmatprep.subr.bf16.mxu1 %v2511_v16  ;;  %v2549_v41 = vld [vmem:[%s3638_s1 + $0x3a4] ss:$8 sps:$4 sm:$0xff]   ;;  %v2552_v43 = vld [vmem:[%s3638_s1 + $0x3a0] ss:$8 sps:$4 sm:$0xff]   ;;  %s165_s30 = scalar_lea.vmem %s3637_s0, %s2478_s17  ;;  %v2553_v44 = vld [vmem:[%s3638_s1 + $0x1b4] ss:$8 sps:$4 sm:$0xff]  }
  0x15   : > { %1154 = vmatprep.subr.bf16.mxu0 %v2513_v17  ;;  %v2555_v45 = vld [vmem:[%s3638_s1 + $0x3b4] ss:$8 sps:$4 sm:$0xff]   ;;  %v2557_v46 = vld [vmem:[%s3638_s1 + $0x1b0] ss:$8 sps:$4 sm:$0xff]   ;;  %v172_v47 = vld [vmem:[%s165_s30 + $0x8] sm:$0xff]  ;;  %vm1732_vm5 = vcmask 1044480  }
  0x16   : > { %v174_v48 = vld [vmem:[%s165_s30 + $0x18] sm:$0xff]  ;;  %v176_v49 = vld [vmem:[%s165_s30 + $0x28] sm:$0x3f]  ;;  %vm246_vm0 = vsmask.f32 7424  ;;  %v171_v61 = vld [vmem:[%s165_s30] sm:$0xff] }
  0x17   : > { %442 = vmatpush1.bf16.msra.mxu1 %v2515_v18  ;;  %v2558_v50 = vld [vmem:[%s3638_s1 + $0x3b0] ss:$8 sps:$4 sm:$0xff]   ;;  %v2559_v51 = vld [vmem:[%s3638_s1 + $0x1c4] ss:$8 sps:$4 sm:$0xff]   ;;  %v3016_v52 = vpack.c.bf16 %v174_v48, %v172_v47  ;;  %v3018_v53 = vpack.c.bf16 %v176_v49, %v176_v49  ;;  %v2563_v55 = vld [vmem:[%s3638_s1 + $0x1c0] ss:$8 sps:$4 sm:$0xff]  }
  0x18   : > { %1155 = vmatpush1.bf16.msra.mxu0 %v2516_v19  ;;  %443 = vmatprep.subr.bf16.mxu1 %v2517_v20  ;;  %v2561_v54 = vld [vmem:[%s3638_s1 + $0x3c4] ss:$8 sps:$4 sm:$0xff]   ;;  %v2564_v56 = vld [vmem:[%s3638_s1 + $0x3c0] ss:$8 sps:$4 sm:$0xff]   ;;  %v173_v62 = vld [vmem:[%s165_s30 + $0x10] sm:$0xff]  ;;  %s2453_s18 = sshll.u32 %s3642_s13, 5 }
  0x19   : > { %1156 = vmatprep.subr.bf16.mxu0 %v2519_v21  ;;  %v3030_v57 = vshrl.u32 %v3016_v52, 16  ;;  %v3033_v58 = vshll.u32 %v3016_v52, 16  ;;  %v3036_v59 = vshll.u32 %v3018_v53, 16  ;;  %v978_v60 = vshrl.u32 %v3018_v53, 16  ;;  %v175_v63 = vld [vmem:[%s165_s30 + $0x20] sm:$0x3f]  ;;  %s170_s21 = scalar_lea.vmem %s3640_s3, %s2453_s18 }
  0x1a   : > { %v2565_v4 = vld [vmem:[%s3638_s1 + $0x1d4] ss:$8 sps:$4 sm:$0xff]   ;;  %v3052_v8 = vpack.c.bf16 %v173_v62, %v171_v61  ;;  %v3054_v9 = vpack.c.bf16 %v175_v63, %v175_v63  ;;  %v2569_v10 = vld [vmem:[%s3638_s1 + $0x1d0] ss:$8 sps:$4 sm:$0xff]   ;;  %vm965_vm1 = vsmask.f32 6400 }
  0x1b   : > { %444 = vmatpush1.bf16.msra.mxu1 %v2521_v22  ;;  %v264_v0 = vrot.slane %v3033_v58, 1  ;;  %v269_v1 = vrot.slane %v3036_v59, 1  ;;  %v975_v2 = vrot.slane %v3030_v57, 1  ;;  %v976_v3 = vrot.slane %v3033_v58, 2  ;;  %v2567_v5 = vld [vmem:[%s3638_s1 + $0x3d4] ss:$8 sps:$4 sm:$0xff]  }
  0x1c   : > { %1157 = vmatpush1.bf16.msra.mxu0 %v2522_v23  ;;  %445 = vmatprep.subr.bf16.mxu1 %v2523_v24  ;;  %v980_v6 = vrot.slane %v978_v60, 1  ;;  %v981_v7 = vrot.slane %v3036_v59, 2  ;;  %v2570_v13 = vld [vmem:[%s3638_s1 + $0x3d0] ss:$8 sps:$4 sm:$0xff]   ;;  %v2571_v14 = vld [vmem:[%s3638_s1 + $0x1e4] ss:$8 sps:$4 sm:$0xff]  }
  0x1d   : > { %1158 = vmatprep.subr.bf16.mxu0 %v2525_v25  ;;  %v265_v11 = vor.u32 %v264_v0, %v3030_v57  ;;  %v977_v12 = vor.u32 %v976_v3, %v975_v2  ;;  %v3067_v16 = vshll.u32 %v3052_v8, 16  ;;  %v2573_v17 = vld [vmem:[%s3638_s1 + $0x3e4] ss:$8 sps:$4 sm:$0xff]   ;;  %v3074_v19 = vshrl.u32 %v3052_v8, 16  ;;  %v2575_v23 = vld [vmem:[%s3638_s1 + $0x1e0] ss:$8 sps:$4 sm:$0xff]  }
  0x1e   : > { %v982_v15 = vor.u32 %v981_v7, %v980_v6  ;;  %v3077_v20 = vshll.u32 %v3054_v9, 16  ;;  %v969_v21 = vshrl.u32 %v3054_v9, 16  ;;  %v2576_v24 = vld [vmem:[%s3638_s1 + $0x3e0] ss:$8 sps:$4 sm:$0xff]   ;;  %v2577_v25 = vld [vmem:[%s3638_s1 + $0x1f4] ss:$8 sps:$4 sm:$0xff]  }
  0x1f   : > { %446 = vmatpush1.bf16.msra.mxu1 %v2527_v26  ;;  %v270_v18 = vsel %vm246_vm0, %v265_v11, %v269_v1  ;;  %v252_v26 = vrot.slane %v3067_v16, 1  ;;  %v1483_v47 = vrot.slane %v3030_v57, 2  ;;  %v2594_v48 = vld [vmem:[%s3638_s1 + $0x414] ss:$8 sps:$4 sm:$0xff]   ;;  %v1484_v49 = vrot.slane %v3033_v58, 3 }
  0x20   : > { %1159 = vmatpush1.bf16.msra.mxu0 %v2528_v27  ;;  %447 = vmatprep.subr.bf16.mxu1 %v2529_v28  ;;  %v983_v22 = vsel %vm965_vm1, %v977_v12, %v982_v15  ;;  %v966_v27 = vrot.slane %v3074_v19, 1  ;;  %v967_v28 = vrot.slane %v3067_v16, 2  ;;  %v2600_v58 = vld [vmem:[%s3638_s1 + $0x424] ss:$8 sps:$4 sm:$0xff]   ;;  %v1487_v61 = vrot.slane %v3036_v59, 3 }
  0x21   : > { %1160 = vmatprep.subr.bf16.mxu0 %v2531_v29  ;;  %465 = vmatprep.mubr.bf16.mxu1 %v270_v18  ;;  %v971_v29 = vrot.slane %v969_v21, 1  ;;  %v1485_v57 = vor.u32 %v1484_v49, %v1483_v47  ;;  %v1476_v62 = vrot.slane %v3074_v19, 2  ;;  %vm1475_vm3 = vsmask.f32 5376  ;;  %v2595_v63 = vld [vmem:[%s3638_s1 + $0x20] ss:$8 sps:$4 sm:$0xff]  }
  0x22   : > { %1178 = vmatprep.mubr.bf16.mxu0 %v983_v22  ;;  %v2598_v0 = vld [vmem:[%s3638_s1 + $0x420] ss:$8 sps:$4 sm:$0xff]   ;;  %v1479_v59 = vrot.slane %v969_v21, 2  ;;  %v2603_v2 = vld [vmem:[%s3638_s1 + $0x34] ss:$8 sps:$4 sm:$0xff]  }
  0x23   : > { %448 = vmatpush1.bf16.msra.mxu1 %v2533_v30  ;;  %v972_v30 = vrot.slane %v3077_v20, 2  ;;  %v2604_v11 = vld [vmem:[%s3638_s1 + $0x430] ss:$8 sps:$4 sm:$0xff]   ;;  %v2609_v12 = vld [vmem:[%s3638_s1 + $0x44] ss:$8 sps:$4 sm:$0xff]  }
  0x24   : > { %1161 = vmatpush1.bf16.msra.mxu0 %v2534_v31  ;;  %449 = vmatprep.subr.bf16.mxu1 %v2535_v32  ;;  %v2579_v31 = vld [vmem:[%s3638_s1 + $0x3f4] ss:$8 sps:$4 sm:$0xff]   ;;  %v2581_v32 = vld [vmem:[%s3638_s1 + $0x1f0] ss:$8 sps:$4 sm:$0xff]   ;;  %v2607_v15 = vld [vmem:[%s3638_s1 + $0x40] ss:$8 sps:$4 sm:$0xff]  }
  0x25   : > { %1162 = vmatprep.subr.bf16.mxu0 %v2537_v33  ;;  %v2582_v33 = vld [vmem:[%s3638_s1 + $0x3f0] ss:$8 sps:$4 sm:$0xff]   ;;  %v2618_v18 = vld [vmem:[%s3638_s1 + $0x454] ss:$8 sps:$4 sm:$0xff]   ;;  %v2621_v21 = vld [vmem:[%s3638_s1 + $0x64] ss:$8 sps:$4 sm:$0xff]  }
  0x26   : > { %v2624_v22 = vld [vmem:[%s3638_s1 + $0x464] ss:$8 sps:$4 sm:$0xff]   ;;  %v2655_v47 = vld [vmem:[%s3638_s1 + $0xc0] ss:$8 sps:$4 sm:$0xff]   ;;  %v2663_v49 = vld [vmem:[%s3638_s1 + $0xd4] ss:$8 sps:$4 sm:$0xff]  }
  0x27   : > { %450 = vmatpush1.bf16.msra.mxu1 %v2539_v34  ;;  %v2585_v34 = vld [vmem:[%s3638_s1 + $0x4] ss:$8 sps:$4 sm:$0xff]  }
  0x28   : > { %1163 = vmatpush1.bf16.msra.mxu0 %v2540_v35  ;;  %451 = vmatprep.subr.bf16.mxu1 %v2541_v36  ;;  %v253_v35 = vor.u32 %v252_v26, %v3074_v19  ;;  %v257_v36 = vrot.slane %v3077_v20, 1  ;;  %v2613_v19 = vld [vmem:[%s3638_s1 + $0x50] ss:$8 sps:$4 sm:$0xff]   ;;  %v2630_v26 = vld [vmem:[%s3638_s1 + $0x474] ss:$8 sps:$4 sm:$0xff]  }
  0x29   : > { %1164 = vmatprep.subr.bf16.mxu0 %v2543_v37  ;;  %v968_v37 = vor.u32 %v967_v28, %v966_v27  ;;  %v2625_v27 = vld [vmem:[%s3638_s1 + $0x70] ss:$8 sps:$4 sm:$0xff]  }
  0x2a   : > { %v2628_v28 = vld [vmem:[%s3638_s1 + $0x470] ss:$8 sps:$4 sm:$0xff]  }
  0x2b   : > { %452 = vmatpush1.bf16.msra.mxu1 %v2545_v38  ;;  %v973_v38 = vor.u32 %v972_v30, %v971_v29  ;;  %v2633_v29 = vld [vmem:[%s3638_s1 + $0x84] ss:$8 sps:$4 sm:$0xff]  }
  0x2c   : > { %1165 = vmatpush1.bf16.msra.mxu0 %v2546_v39  ;;  %453 = vmatprep.subr.bf16.mxu1 %v2547_v40  ;;  %v2588_v39 = vld [vmem:[%s3638_s1 + $0x404] ss:$8 sps:$4 sm:$0xff]   ;;  %v2583_v40 = vld [vmem:[%s3638_s1] ss:$8 sps:$4 sm:$0xff]  }
  0x2d   : > { %1166 = vmatprep.subr.bf16.mxu0 %v2549_v41  ;;  %v2586_v41 = vld [vmem:[%s3638_s1 + $0x400] ss:$8 sps:$4 sm:$0xff]   ;;  %v2636_v30 = vld [vmem:[%s3638_s1 + $0x484] ss:$8 sps:$4 sm:$0xff]  }
  0x2f   : > { %454 = vmatpush1.bf16.msra.mxu1 %v2551_v42  ;;  %v1230_v42 = vrot.slane %v3016_v52, 2 }
  0x30   : > { %1167 = vmatpush1.bf16.msra.mxu0 %v2552_v43  ;;  %455 = vmatprep.subr.bf16.mxu1 %v2553_v44  ;;  %v1231_v43 = vrot.slane %v3018_v53, 2  ;;  %v258_v44 = vsel %vm246_vm0, %v253_v35, %v257_v36  ;;  %v2637_v35 = vld [vmem:[%s3638_s1 + $0x90] ss:$8 sps:$4 sm:$0xff]  }
  0x31   : > { %1168 = vmatprep.subr.bf16.mxu0 %v2555_v45  ;;  %v974_v45 = vsel %vm965_vm1, %v968_v37, %v973_v38  ;;  %v2640_v36 = vld [vmem:[%s3638_s1 + $0x490] ss:$8 sps:$4 sm:$0xff]   ;;  %v2645_v37 = vld [vmem:[%s3638_s1 + $0xa4] ss:$8 sps:$4 sm:$0xff]  }
  0x32   : > { %v2648_v38 = vld [vmem:[%s3638_s1 + $0x4a4] ss:$8 sps:$4 sm:$0xff]  }
  0x33   : > { %456 = vmatpush1.bf16.msra.mxu1 %v2557_v46  ;;  %v2591_v46 = vld [vmem:[%s3638_s1 + $0x14] ss:$8 sps:$4 sm:$0xff]  }
  0x34   : > { %1169 = vmatpush1.bf16.msra.mxu0 %v2558_v50  ;;  %457 = vmatprep.subr.bf16.mxu1 %v2559_v51  ;;  %v2589_v50 = vld [vmem:[%s3638_s1 + $0x10] ss:$8 sps:$4 sm:$0xff]  }
  0x35   : > { %1170 = vmatprep.subr.bf16.mxu0 %v2561_v54  ;;  %v2592_v51 = vld [vmem:[%s3638_s1 + $0x410] ss:$8 sps:$4 sm:$0xff]   ;;  %v1232_v54 = vsel %vm1226_vm2, %v1230_v42, %v1231_v43  ;;  %v2654_v42 = vld [vmem:[%s3638_s1 + $0x4b4] ss:$8 sps:$4 sm:$0xff]  }
  0x36   : > { %v2649_v43 = vld [vmem:[%s3638_s1 + $0xb0] ss:$8 sps:$4 sm:$0xff]  }
  0x37   : > { %458 = vmatpush1.bf16.msra.mxu1 %v2563_v55  ;;  %v1486_v55 = vrot.slane %v978_v60, 2  ;;  %v1477_v60 = vrot.slane %v3067_v16, 3  ;;  %v2610_v16 = vld [vmem:[%s3638_s1 + $0x440] ss:$8 sps:$4 sm:$0xff]  }
  0x38   : > { %1171 = vmatpush1.bf16.msra.mxu0 %v2564_v56  ;;  %459 = vmatprep.subr.bf16.mxu1 %v2565_v4  ;;  %v2597_v56 = vld [vmem:[%s3638_s1 + $0x24] ss:$8 sps:$4 sm:$0xff]   ;;  %v1480_v4 = vrot.slane %v3077_v20, 3  ;;  %v2616_v20 = vld [vmem:[%s3638_s1 + $0x450] ss:$8 sps:$4 sm:$0xff]  }
  0x39   : > { %1172 = vmatprep.subr.bf16.mxu0 %v2567_v5  ;;  %v1488_v1 = vor.u32 %v1487_v61, %v1486_v55  ;;  %v1478_v3 = vor.u32 %v1477_v60, %v1476_v62  ;;  %v2606_v5 = vld [vmem:[%s3638_s1 + $0x434] ss:$8 sps:$4 sm:$0xff]   ;;  %v2669_v55 = vld [vmem:[%s3638_s1 + $0xe4] ss:$8 sps:$4 sm:$0xff]   ;;  %v2673_v60 = vld [vmem:[%s3638_s1 + $0xf0] ss:$8 sps:$4 sm:$0xff]  }
  0x3a   : > { %v1481_v7 = vor.u32 %v1480_v4, %v1479_v59  ;;  %v2675_v61 = vld [vmem:[%s3638_s1 + $0xf4] ss:$8 sps:$4 sm:$0xff]   ;;  %v1228_v59 = vrot.slane %v3054_v9, 2  ;;  %v2679_v4 = vld [vmem:[%s3638_s1 + $0x200] ss:$8 sps:$4 sm:$0xff]  }
  0x3b   : > { %460 = vmatpush1.bf16.msra.mxu1 %v2569_v10  ;;  %v3166_v6 = vsel %vm1475_vm3, %v1485_v57, %v1488_v1  ;;  %v2601_v10 = vld [vmem:[%s3638_s1 + $0x30] ss:$8 sps:$4 sm:$0xff]   ;;  %v2667_v57 = vld [vmem:[%s3638_s1 + $0xe0] ss:$8 sps:$4 sm:$0xff]   ;;  %v2678_v62 = vld [vmem:[%s3638_s1 + $0x4f4] ss:$8 sps:$4 sm:$0xff]  }
  0x3c   : > { %1173 = vmatpush1.bf16.msra.mxu0 %v2570_v13  ;;  %461 = vmatprep.subr.bf16.mxu1 %v2571_v14  ;;  %v3178_v13 = vsel %vm1475_vm3, %v1478_v3, %v1481_v7  ;;  %v2612_v14 = vld [vmem:[%s3638_s1 + $0x444] ss:$8 sps:$4 sm:$0xff]   ;;  %v1227_v1 = vrot.slane %v3052_v8, 2  ;;  %v720_v3 = vrot.slane %v3016_v52, 1  ;;  %v721_v7 = vrot.slane %v3018_v53, 1 }
  0x3d   : > { %1174 = vmatprep.subr.bf16.mxu0 %v2573_v17  ;;  %v2615_v17 = vld [vmem:[%s3638_s1 + $0x54] ss:$8 sps:$4 sm:$0xff]  }
  0x3f   : > { %462 = vmatpush1.bf16.msra.mxu1 %v2575_v23  ;;  %v2619_v23 = vld [vmem:[%s3638_s1 + $0x60] ss:$8 sps:$4 sm:$0xff]  }
  0x40   : > { %1175 = vmatpush1.bf16.msra.mxu0 %v2576_v24  ;;  %463 = vmatprep.subr.bf16.mxu1 %v2577_v25  ;;  %v2622_v24 = vld [vmem:[%s3638_s1 + $0x460] ss:$8 sps:$4 sm:$0xff]   ;;  %v2627_v25 = vld [vmem:[%s3638_s1 + $0x74] ss:$8 sps:$4 sm:$0xff]  }
  0x41   : > { %1176 = vmatprep.subr.bf16.mxu0 %v2579_v31  ;;  %v2631_v31 = vld [vmem:[%s3638_s1 + $0x80] ss:$8 sps:$4 sm:$0xff]  }
  0x43   : > { %464 = vmatpush1.bf16.msra.mxu1 %v2581_v32  ;;  %v2634_v32 = vld [vmem:[%s3638_s1 + $0x480] ss:$8 sps:$4 sm:$0xff]  }
  0x44   : > { %1177 = vmatpush1.bf16.msra.mxu0 %v2582_v33  ;;  %636 = vmatprep.subr.bf16.mxu1 %v2585_v34  ;;  %v2639_v33 = vld [vmem:[%s3638_s1 + $0x94] ss:$8 sps:$4 sm:$0xff]  }
  0x45   : > { %1395 = vmatprep.subr.bf16.mxu0 %v2588_v39  ;;  %v2642_v34 = vld [vmem:[%s3638_s1 + $0x494] ss:$8 sps:$4 sm:$0xff]   ;;  %v2643_v39 = vld [vmem:[%s3638_s1 + $0xa0] ss:$8 sps:$4 sm:$0xff]  }
  0x46   : > { %466 = vmatmul.mubr.bf16.vlgmr.msra.gmra.mrb[0].mxu1 %v258_v44  ;;  %v2652_v44 = vld [vmem:[%s3638_s1 + $0x4b0] ss:$8 sps:$4 sm:$0xff]  }
  0x47   : > { %1179 = vmatmul.mubr.bf16.vlgmr.msra.gmra.mrb[0].mxu0 %v974_v45  ;;  %637 = vmatpush1.bf16.msra.mxu1 %v2583_v40  ;;  %v2646_v40 = vld [vmem:[%s3638_s1 + $0x4a0] ss:$8 sps:$4 sm:$0xff]   ;;  %v2657_v45 = vld [vmem:[%s3638_s1 + $0xc4] ss:$8 sps:$4 sm:$0xff]  }
  0x48   : > { %1396 = vmatpush1.bf16.msra.mxu0 %v2586_v41  ;;  %638 = vmatprep.subr.bf16.mxu1 %v2591_v46  ;;  %v2651_v41 = vld [vmem:[%s3638_s1 + $0xb4] ss:$8 sps:$4 sm:$0xff]   ;;  %v2660_v46 = vld [vmem:[%s3638_s1 + $0x4c4] ss:$8 sps:$4 sm:$0xff]  }
  0x49   : > { %1397 = vmatprep.subr.bf16.mxu0 %v2594_v48  ;;  %668 = vmatprep.mubr.bf16.mxu1 %v3016_v52  ;;  %v2658_v48 = vld [vmem:[%s3638_s1 + $0x4c0] ss:$8 sps:$4 sm:$0xff]  }
  0x4a   : > { %1427 = vmatprep.mubr.bf16.mxu0 %v1232_v54  ;;  %v2664_v54 = vld [vmem:[%s3638_s1 + $0x4d0] ss:$8 sps:$4 sm:$0xff]  }
  0x4b   : > { %639 = vmatpush1.bf16.msra.mxu1 %v2589_v50  ;;  %v2666_v50 = vld [vmem:[%s3638_s1 + $0x4d4] ss:$8 sps:$4 sm:$0xff]  }
  0x4c   : > { %1398 = vmatpush1.bf16.msra.mxu0 %v2592_v51  ;;  %640 = vmatprep.subr.bf16.mxu1 %v2597_v56  ;;  %v2661_v51 = vld [vmem:[%s3638_s1 + $0xd0] ss:$8 sps:$4 sm:$0xff]   ;;  %v2672_v56 = vld [vmem:[%s3638_s1 + $0x4e4] ss:$8 sps:$4 sm:$0xff]  }
  0x4d   : > { %1399 = vmatprep.subr.bf16.mxu0 %v2600_v58  ;;  %v2670_v58 = vld [vmem:[%s3638_s1 + $0x4e0] ss:$8 sps:$4 sm:$0xff]  }
  0x4f   : > { %641 = vmatpush1.bf16.msra.mxu1 %v2595_v63  ;;  %v2676_v63 = vld [vmem:[%s3638_s1 + $0x4f0] ss:$8 sps:$4 sm:$0xff]  }
  0x50   : > { %1400 = vmatpush1.bf16.msra.mxu0 %v2598_v0  ;;  %642 = vmatprep.subr.bf16.mxu1 %v2603_v2  ;;  %v2681_v0 = vld [vmem:[%s3638_s1 + $0x204] ss:$8 sps:$4 sm:$0xff]  }
  0x51   : > { %1401 = vmatprep.subr.bf16.mxu0 %v2606_v5  ;;  %v2684_v2 = vld [vmem:[%s3638_s1 + $0x504] ss:$8 sps:$4 sm:$0xff]   ;;  %v2682_v5 = vld [vmem:[%s3638_s1 + $0x500] ss:$8 sps:$4 sm:$0xff]  }
  0x53   : > { %643 = vmatpush1.bf16.msra.mxu1 %v2601_v10  ;;  %v1229_v10 = vsel %vm1226_vm2, %v1227_v1, %v1228_v59  ;;  %v2757_v1 = vld [vmem:[%s3638_s1 + $0x2d0] ss:$8 sps:$4 sm:$0xff]  }
  0x54   : > { %1402 = vmatpush1.bf16.msra.mxu0 %v2604_v11  ;;  %644 = vmatprep.subr.bf16.mxu1 %v2609_v12  ;;  %v2687_v11 = vld [vmem:[%s3638_s1 + $0x214] ss:$8 sps:$4 sm:$0xff]   ;;  %v2760_v59 = vld [vmem:[%s3638_s1 + $0x5d0] ss:$8 sps:$4 sm:$0xff]  }
  0x55   : > { %1403 = vmatprep.subr.bf16.mxu0 %v2612_v14  ;;  %v2690_v12 = vld [vmem:[%s3638_s1 + $0x514] ss:$8 sps:$4 sm:$0xff]   ;;  %v2685_v14 = vld [vmem:[%s3638_s1 + $0x210] ss:$8 sps:$4 sm:$0xff]  }
  0x57   : > { %645 = vmatpush1.bf16.msra.mxu1 %v2607_v15  ;;  %v2688_v15 = vld [vmem:[%s3638_s1 + $0x510] ss:$8 sps:$4 sm:$0xff]  }
  0x58   : > { %1404 = vmatpush1.bf16.msra.mxu0 %v2610_v16  ;;  %646 = vmatprep.subr.bf16.mxu1 %v2615_v17  ;;  %v722_v16 = vsel %vm716_vm4, %v720_v3, %v721_v7  ;;  %v2693_v17 = vld [vmem:[%s3638_s1 + $0x224] ss:$8 sps:$4 sm:$0xff]   ;;  %v2771_v7 = vld [vmem:[%s3638_s1 + $0x2f4] ss:$8 sps:$4 sm:$0xff]  }
  0x59   : > { %1405 = vmatprep.subr.bf16.mxu0 %v2618_v18  ;;  %v2696_v18 = vld [vmem:[%s3638_s1 + $0x524] ss:$8 sps:$4 sm:$0xff]  }
  0x5a   : > { %v2768_v3 = vld [vmem:[%s3638_s1 + $0x5e4] ss:$8 sps:$4 sm:$0xff]  }
  0x5b   : > { %647 = vmatpush1.bf16.msra.mxu1 %v2613_v19  ;;  %v2691_v19 = vld [vmem:[%s3638_s1 + $0x220] ss:$8 sps:$4 sm:$0xff]  }
  0x5c   : > { %1406 = vmatpush1.bf16.msra.mxu0 %v2616_v20  ;;  %648 = vmatprep.subr.bf16.mxu1 %v2621_v21  ;;  %v2694_v20 = vld [vmem:[%s3638_s1 + $0x520] ss:$8 sps:$4 sm:$0xff]   ;;  %v2699_v21 = vld [vmem:[%s3638_s1 + $0x234] ss:$8 sps:$4 sm:$0xff]  }
  0x5d   : > { %1407 = vmatprep.subr.bf16.mxu0 %v2624_v22  ;;  %v2697_v22 = vld [vmem:[%s3638_s1 + $0x230] ss:$8 sps:$4 sm:$0xff]  }
  0x5f   : > { %649 = vmatpush1.bf16.msra.mxu1 %v2619_v23  ;;  %v2700_v23 = vld [vmem:[%s3638_s1 + $0x530] ss:$8 sps:$4 sm:$0xff]  }
  0x60   : > { %1408 = vmatpush1.bf16.msra.mxu0 %v2622_v24  ;;  %650 = vmatprep.subr.bf16.mxu1 %v2627_v25  ;;  %v2705_v24 = vld [vmem:[%s3638_s1 + $0x244] ss:$8 sps:$4 sm:$0xff]  }
  0x61   : > { %1409 = vmatprep.subr.bf16.mxu0 %v2630_v26  ;;  %v2708_v25 = vld [vmem:[%s3638_s1 + $0x544] ss:$8 sps:$4 sm:$0xff]   ;;  %v2703_v26 = vld [vmem:[%s3638_s1 + $0x240] ss:$8 sps:$4 sm:$0xff]  }
  0x63   : > { %651 = vmatpush1.bf16.msra.mxu1 %v2625_v27  ;;  %v2706_v27 = vld [vmem:[%s3638_s1 + $0x540] ss:$8 sps:$4 sm:$0xff]  }
  0x64   : > { %1410 = vmatpush1.bf16.msra.mxu0 %v2628_v28  ;;  %652 = vmatprep.subr.bf16.mxu1 %v2633_v29  ;;  %v2711_v28 = vld [vmem:[%s3638_s1 + $0x254] ss:$8 sps:$4 sm:$0xff]  }
  0x65   : > { %1411 = vmatprep.subr.bf16.mxu0 %v2636_v30  ;;  %v2714_v29 = vld [vmem:[%s3638_s1 + $0x554] ss:$8 sps:$4 sm:$0xff]   ;;  %v2709_v30 = vld [vmem:[%s3638_s1 + $0x250] ss:$8 sps:$4 sm:$0xff]  }
  0x67   : > { %653 = vmatpush1.bf16.msra.mxu1 %v2631_v31  ;;  %v2712_v31 = vld [vmem:[%s3638_s1 + $0x550] ss:$8 sps:$4 sm:$0xff]  }
  0x68   : > { %1412 = vmatpush1.bf16.msra.mxu0 %v2634_v32  ;;  %654 = vmatprep.subr.bf16.mxu1 %v2639_v33  ;;  %v2717_v32 = vld [vmem:[%s3638_s1 + $0x264] ss:$8 sps:$4 sm:$0xff]  }
  0x69   : > { %1413 = vmatprep.subr.bf16.mxu0 %v2642_v34  ;;  %v2720_v33 = vld [vmem:[%s3638_s1 + $0x564] ss:$8 sps:$4 sm:$0xff]   ;;  %v2715_v34 = vld [vmem:[%s3638_s1 + $0x260] ss:$8 sps:$4 sm:$0xff]  }
  0x6b   : > { %655 = vmatpush1.bf16.msra.mxu1 %v2637_v35  ;;  %v2718_v35 = vld [vmem:[%s3638_s1 + $0x560] ss:$8 sps:$4 sm:$0xff]  }
  0x6c   : > { %1414 = vmatpush1.bf16.msra.mxu0 %v2640_v36  ;;  %656 = vmatprep.subr.bf16.mxu1 %v2645_v37  ;;  %v2723_v36 = vld [vmem:[%s3638_s1 + $0x274] ss:$8 sps:$4 sm:$0xff]  }
  0x6d   : > { %1415 = vmatprep.subr.bf16.mxu0 %v2648_v38  ;;  %v2726_v37 = vld [vmem:[%s3638_s1 + $0x574] ss:$8 sps:$4 sm:$0xff]   ;;  %v2721_v38 = vld [vmem:[%s3638_s1 + $0x270] ss:$8 sps:$4 sm:$0xff]  }
  0x6f   : > { %657 = vmatpush1.bf16.msra.mxu1 %v2643_v39  ;;  %v2724_v39 = vld [vmem:[%s3638_s1 + $0x570] ss:$8 sps:$4 sm:$0xff]  }
  0x70   : > { %1416 = vmatpush1.bf16.msra.mxu0 %v2646_v40  ;;  %658 = vmatprep.subr.bf16.mxu1 %v2651_v41  ;;  %v2729_v40 = vld [vmem:[%s3638_s1 + $0x284] ss:$8 sps:$4 sm:$0xff]  }
  0x71   : > { %1417 = vmatprep.subr.bf16.mxu0 %v2654_v42  ;;  %v2732_v41 = vld [vmem:[%s3638_s1 + $0x584] ss:$8 sps:$4 sm:$0xff]   ;;  %v2727_v42 = vld [vmem:[%s3638_s1 + $0x280] ss:$8 sps:$4 sm:$0xff]  }
  0x73   : > { %659 = vmatpush1.bf16.msra.mxu1 %v2649_v43  ;;  %v2730_v43 = vld [vmem:[%s3638_s1 + $0x580] ss:$8 sps:$4 sm:$0xff]  }
  0x74   : > { %1418 = vmatpush1.bf16.msra.mxu0 %v2652_v44  ;;  %660 = vmatprep.subr.bf16.mxu1 %v2657_v45  ;;  %v2735_v44 = vld [vmem:[%s3638_s1 + $0x294] ss:$8 sps:$4 sm:$0xff]  }
  0x75   : > { %1419 = vmatprep.subr.bf16.mxu0 %v2660_v46  ;;  %v2738_v45 = vld [vmem:[%s3638_s1 + $0x594] ss:$8 sps:$4 sm:$0xff]   ;;  %v2733_v46 = vld [vmem:[%s3638_s1 + $0x290] ss:$8 sps:$4 sm:$0xff]  }
  0x77   : > { %661 = vmatpush1.bf16.msra.mxu1 %v2655_v47  ;;  %v2736_v47 = vld [vmem:[%s3638_s1 + $0x590] ss:$8 sps:$4 sm:$0xff]  }
  0x78   : > { %1420 = vmatpush1.bf16.msra.mxu0 %v2658_v48  ;;  %662 = vmatprep.subr.bf16.mxu1 %v2663_v49  ;;  %v2741_v48 = vld [vmem:[%s3638_s1 + $0x2a4] ss:$8 sps:$4 sm:$0xff]  }
  0x79   : > { %1421 = vmatprep.subr.bf16.mxu0 %v2666_v50  ;;  %v2744_v49 = vld [vmem:[%s3638_s1 + $0x5a4] ss:$8 sps:$4 sm:$0xff]   ;;  %v2739_v50 = vld [vmem:[%s3638_s1 + $0x2a0] ss:$8 sps:$4 sm:$0xff]  }
  0x7b   : > { %663 = vmatpush1.bf16.msra.mxu1 %v2661_v51  ;;  %v2742_v51 = vld [vmem:[%s3638_s1 + $0x5a0] ss:$8 sps:$4 sm:$0xff]  }
  0x7c   : > { %1422 = vmatpush1.bf16.msra.mxu0 %v2664_v54  ;;  %664 = vmatprep.subr.bf16.mxu1 %v2669_v55  ;;  %v2747_v54 = vld [vmem:[%s3638_s1 + $0x2b4] ss:$8 sps:$4 sm:$0xff]  }
  0x7d   : > { %1423 = vmatprep.subr.bf16.mxu0 %v2672_v56  ;;  %v2750_v55 = vld [vmem:[%s3638_s1 + $0x5b4] ss:$8 sps:$4 sm:$0xff]   ;;  %v2745_v56 = vld [vmem:[%s3638_s1 + $0x2b0] ss:$8 sps:$4 sm:$0xff]  }
  0x7f   : > { %665 = vmatpush1.bf16.msra.mxu1 %v2667_v57  ;;  %v2748_v57 = vld [vmem:[%s3638_s1 + $0x5b0] ss:$8 sps:$4 sm:$0xff]  }
  0x80   : > { %1424 = vmatpush1.bf16.msra.mxu0 %v2670_v58  ;;  %666 = vmatprep.subr.bf16.mxu1 %v2675_v61  ;;  %v2753_v58 = vld [vmem:[%s3638_s1 + $0x2c4] ss:$8 sps:$4 sm:$0xff]  }
  0x81   : > { %1425 = vmatprep.subr.bf16.mxu0 %v2678_v62  ;;  %v2756_v61 = vld [vmem:[%s3638_s1 + $0x5c4] ss:$8 sps:$4 sm:$0xff]   ;;  %v2751_v62 = vld [vmem:[%s3638_s1 + $0x2c0] ss:$8 sps:$4 sm:$0xff]  }
  0x83   : > { %667 = vmatpush1.bf16.msra.mxu1 %v2673_v60  ;;  %v2754_v60 = vld [vmem:[%s3638_s1 + $0x5c0] ss:$8 sps:$4 sm:$0xff]  }
  0x84   : > { %1426 = vmatpush1.bf16.msra.mxu0 %v2676_v63  ;;  %885 = vmatprep.subr.bf16.mxu1 %v2681_v0  ;;  %v2759_v63 = vld [vmem:[%s3638_s1 + $0x2d4] ss:$8 sps:$4 sm:$0xff]  }
  0x85   : > { %1652 = vmatprep.subr.bf16.mxu0 %v2684_v2  ;;  %v2762_v0 = vld [vmem:[%s3638_s1 + $0x5d4] ss:$8 sps:$4 sm:$0xff]   ;;  %v2765_v2 = vld [vmem:[%s3638_s1 + $0x2e4] ss:$8 sps:$4 sm:$0xff]  }
  0x86   : > { %669 = vmatmul.mubr.bf16.vlgmr.msra.gmra.mrb[0].mxu1 %v3052_v8 }
  0x87   : > { %1428 = vmatmul.mubr.bf16.vlgmr.msra.gmra.mrb[0].mxu0 %v1229_v10  ;;  %886 = vmatpush1.bf16.msra.mxu1 %v2679_v4  ;;  %v2763_v4 = vld [vmem:[%s3638_s1 + $0x2e0] ss:$8 sps:$4 sm:$0xff]   ;;  %v2774_v10 = vld [vmem:[%s3638_s1 + $0x5f4] ss:$8 sps:$4 sm:$0xff]  }
  0x88   : > { %1653 = vmatpush1.bf16.msra.mxu0 %v2682_v5  ;;  %887 = vmatprep.subr.bf16.mxu1 %v2687_v11  ;;  %v2766_v5 = vld [vmem:[%s3638_s1 + $0x5e0] ss:$8 sps:$4 sm:$0xff]   ;;  %v2769_v11 = vld [vmem:[%s3638_s1 + $0x2f0] ss:$8 sps:$4 sm:$0xff]  }
  0x89   : > { %1654 = vmatprep.subr.bf16.mxu0 %v2690_v12  ;;  %917 = vmatprep.mubr.bf16.mxu1 %v722_v16  ;;  %v2772_v12 = vld [vmem:[%s3638_s1 + $0x5f0] ss:$8 sps:$4 sm:$0xff]   ;;  %v2777_v16 = vld [vmem:[%s3638_s1 + $0x604] ss:$8 sps:$4 sm:$0xff]  }
  0x8a   : > { %1684 = vmatprep.mubr.bf16.mxu0 %v3166_v6  ;;  %v2702_v6 = vld [vmem:[%s3638_s1 + $0x534] ss:$8 sps:$4 sm:$0xff]  }
  0x8b   : > { %888 = vmatpush1.bf16.msra.mxu1 %v2685_v14  ;;  %v717_v14 = vrot.slane %v3052_v8, 1 }
  0x8c   : > { %1655 = vmatpush1.bf16.msra.mxu0 %v2688_v15  ;;  %889 = vmatprep.subr.bf16.mxu1 %v2693_v17  ;;  %v718_v15 = vrot.slane %v3054_v9, 1  ;;  %v1736_v17 = vrot.slane %v3016_v52, 3  ;;  %v2778_v52 = vld [vmem:[%s3638_s1 + $0x610] ss:$8 sps:$4 sm:$0xff]  }
  0x8d   : > { %1656 = vmatprep.subr.bf16.mxu0 %v2696_v18  ;;  %v1737_v18 = vrot.slane %v3018_v53, 3  ;;  %v2783_v53 = vld [vmem:[%s3638_s1 + $0x624] ss:$8 sps:$4 sm:$0xff]  }
  0x8f   : > { %890 = vmatpush1.bf16.msra.mxu1 %v2691_v19  ;;  %v719_v19 = vsel %vm716_vm4, %v717_v14, %v718_v15 }
  0x90   : > { %1657 = vmatpush1.bf16.msra.mxu0 %v2694_v20  ;;  %891 = vmatprep.subr.bf16.mxu1 %v2699_v21  ;;  %v2775_v20 = vld [vmem:[%s3638_s1 + $0x600] ss:$8 sps:$4 sm:$0xff]   ;;  %v2780_v21 = vld [vmem:[%s3638_s1 + $0x614] ss:$8 sps:$4 sm:$0xff]  }
  0x91   : > { %1658 = vmatprep.subr.bf16.mxu0 %v2702_v6  ;;  %v1738_v6 = vsel %vm1732_vm5, %v1736_v17, %v1737_v18 }
  0x93   : > { %892 = vmatpush1.bf16.msra.mxu1 %v2697_v22  ;;  %v2781_v22 = vld [vmem:[%s3638_s1 + $0x620] ss:$8 sps:$4 sm:$0xff]  }
  0x94   : > { %1659 = vmatpush1.bf16.msra.mxu0 %v2700_v23  ;;  %893 = vmatprep.subr.bf16.mxu1 %v2705_v24  ;;  %v2784_v23 = vld [vmem:[%s3638_s1 + $0x630] ss:$8 sps:$4 sm:$0xff]   ;;  %v2789_v24 = vld [vmem:[%s3638_s1 + $0x644] ss:$8 sps:$4 sm:$0xff]  }
  0x95   : > { %1660 = vmatprep.subr.bf16.mxu0 %v2708_v25  ;;  %v2787_v25 = vld [vmem:[%s3638_s1 + $0x640] ss:$8 sps:$4 sm:$0xff]  }
  0x97   : > { %894 = vmatpush1.bf16.msra.mxu1 %v2703_v26  ;;  %v2792_v26 = vld [vmem:[%s3638_s1 + $0x654] ss:$8 sps:$4 sm:$0xff]  }
  0x98   : > { %1661 = vmatpush1.bf16.msra.mxu0 %v2706_v27  ;;  %895 = vmatprep.subr.bf16.mxu1 %v2711_v28  ;;  %v2790_v27 = vld [vmem:[%s3638_s1 + $0x650] ss:$8 sps:$4 sm:$0xff]   ;;  %v2795_v28 = vld [vmem:[%s3638_s1 + $0x664] ss:$8 sps:$4 sm:$0xff]  }
  0x99   : > { %1662 = vmatprep.subr.bf16.mxu0 %v2714_v29  ;;  %v2793_v29 = vld [vmem:[%s3638_s1 + $0x660] ss:$8 sps:$4 sm:$0xff]  }
  0x9b   : > { %896 = vmatpush1.bf16.msra.mxu1 %v2709_v30  ;;  %v2798_v30 = vld [vmem:[%s3638_s1 + $0x674] ss:$8 sps:$4 sm:$0xff]  }
  0x9c   : > { %1663 = vmatpush1.bf16.msra.mxu0 %v2712_v31  ;;  %897 = vmatprep.subr.bf16.mxu1 %v2717_v32  ;;  %v2796_v31 = vld [vmem:[%s3638_s1 + $0x670] ss:$8 sps:$4 sm:$0xff]   ;;  %v2801_v32 = vld [vmem:[%s3638_s1 + $0x684] ss:$8 sps:$4 sm:$0xff]  }
  0x9d   : > { %1664 = vmatprep.subr.bf16.mxu0 %v2720_v33  ;;  %v2799_v33 = vld [vmem:[%s3638_s1 + $0x680] ss:$8 sps:$4 sm:$0xff]  }
  0x9f   : > { %898 = vmatpush1.bf16.msra.mxu1 %v2715_v34  ;;  %v2804_v34 = vld [vmem:[%s3638_s1 + $0x694] ss:$8 sps:$4 sm:$0xff]  }
  0xa0   : > { %1665 = vmatpush1.bf16.msra.mxu0 %v2718_v35  ;;  %899 = vmatprep.subr.bf16.mxu1 %v2723_v36  ;;  %v2802_v35 = vld [vmem:[%s3638_s1 + $0x690] ss:$8 sps:$4 sm:$0xff]   ;;  %v2807_v36 = vld [vmem:[%s3638_s1 + $0x6a4] ss:$8 sps:$4 sm:$0xff]  }
  0xa1   : > { %1666 = vmatprep.subr.bf16.mxu0 %v2726_v37  ;;  %v2805_v37 = vld [vmem:[%s3638_s1 + $0x6a0] ss:$8 sps:$4 sm:$0xff]  }
  0xa3   : > { %900 = vmatpush1.bf16.msra.mxu1 %v2721_v38  ;;  %v2810_v38 = vld [vmem:[%s3638_s1 + $0x6b4] ss:$8 sps:$4 sm:$0xff]  }
  0xa4   : > { %1667 = vmatpush1.bf16.msra.mxu0 %v2724_v39  ;;  %901 = vmatprep.subr.bf16.mxu1 %v2729_v40  ;;  %v2808_v39 = vld [vmem:[%s3638_s1 + $0x6b0] ss:$8 sps:$4 sm:$0xff]   ;;  %v2813_v40 = vld [vmem:[%s3638_s1 + $0x6c4] ss:$8 sps:$4 sm:$0xff]  }
  0xa5   : > { %1668 = vmatprep.subr.bf16.mxu0 %v2732_v41  ;;  %v2811_v41 = vld [vmem:[%s3638_s1 + $0x6c0] ss:$8 sps:$4 sm:$0xff]  }
  0xa7   : > { %902 = vmatpush1.bf16.msra.mxu1 %v2727_v42  ;;  %v2816_v42 = vld [vmem:[%s3638_s1 + $0x6d4] ss:$8 sps:$4 sm:$0xff]  }
  0xa8   : > { %1669 = vmatpush1.bf16.msra.mxu0 %v2730_v43  ;;  %903 = vmatprep.subr.bf16.mxu1 %v2735_v44  ;;  %v2814_v43 = vld [vmem:[%s3638_s1 + $0x6d0] ss:$8 sps:$4 sm:$0xff]   ;;  %v2819_v44 = vld [vmem:[%s3638_s1 + $0x6e4] ss:$8 sps:$4 sm:$0xff]  }
  0xa9   : > { %1670 = vmatprep.subr.bf16.mxu0 %v2738_v45  ;;  %v2817_v45 = vld [vmem:[%s3638_s1 + $0x6e0] ss:$8 sps:$4 sm:$0xff]  }
  0xab   : > { %904 = vmatpush1.bf16.msra.mxu1 %v2733_v46  ;;  %v2822_v46 = vld [vmem:[%s3638_s1 + $0x6f4] ss:$8 sps:$4 sm:$0xff]  }
  0xac   : > { %1671 = vmatpush1.bf16.msra.mxu0 %v2736_v47  ;;  %905 = vmatprep.subr.bf16.mxu1 %v2741_v48  ;;  %v2820_v47 = vld [vmem:[%s3638_s1 + $0x6f0] ss:$8 sps:$4 sm:$0xff]   ;;  %v1733_v48 = vrot.slane %v3052_v8, 3 }
  0xad   : > { %1672 = vmatprep.subr.bf16.mxu0 %v2744_v49  ;;  %v1734_v49 = vrot.slane %v3054_v9, 3 }
  0xaf   : > { %906 = vmatpush1.bf16.msra.mxu1 %v2739_v50  ;;  %v1735_v50 = vsel %vm1732_vm5, %v1733_v48, %v1734_v49 }
  0xb0   : > { %1673 = vmatpush1.bf16.msra.mxu0 %v2742_v51  ;;  %907 = vmatprep.subr.bf16.mxu1 %v2747_v54 }
  0xb1   : > { %1674 = vmatprep.subr.bf16.mxu0 %v2750_v55 }
  0xb3   : > { %908 = vmatpush1.bf16.msra.mxu1 %v2745_v56 }
  0xb4   : > { %1675 = vmatpush1.bf16.msra.mxu0 %v2748_v57  ;;  %909 = vmatprep.subr.bf16.mxu1 %v2753_v58  ;;  %v1950_v57 = vlaneseq }
  0xb5   : > { %1676 = vmatprep.subr.bf16.mxu0 %v2756_v61 }
  0xb6   : > { %v1951_v58 = vshrl.u32 %v1950_v57, 7 }
  0xb7   : > { %910 = vmatpush1.bf16.msra.mxu1 %v2751_v62  ;;  %v1948_v62 = vld [vmem:[%s3639_s2] sm:$0x3] }
  0xb8   : > { %1677 = vmatpush1.bf16.msra.mxu0 %v2754_v60  ;;  %911 = vmatprep.subr.bf16.mxu1 %v2759_v63  ;;  %v1952_v61 = vsub.s32 0, %v1951_v58  ;;  %v1956_v8 = vsub.s32 1, %v1951_v58 }
  0xb9   : > { %1678 = vmatprep.subr.bf16.mxu0 %v2762_v0 }
  0xba   : > { %v1953_v60 = vrot.slane %v1948_v62, %v1952_v61  ;;  %v1957_v63 = vrot.slane %v1948_v62, %v1956_v8 }
  0xbb   : > { %912 = vmatpush1.bf16.msra.mxu1 %v2757_v1 }
  0xbc   : > { %1679 = vmatpush1.bf16.msra.mxu0 %v2760_v59  ;;  %913 = vmatprep.subr.bf16.mxu1 %v2765_v2 }
  0xbd   : > { %1680 = vmatprep.subr.bf16.mxu0 %v2768_v3 }
  0xbf   : > { %914 = vmatpush1.bf16.msra.mxu1 %v2763_v4 }
  0xc0   : > { %1681 = vmatpush1.bf16.msra.mxu0 %v2766_v5  ;;  %915 = vmatprep.subr.bf16.mxu1 %v2771_v7 }
  0xc1   : > { %1682 = vmatprep.subr.bf16.mxu0 %v2774_v10 }
  0xc3   : > { %916 = vmatpush1.bf16.msra.mxu1 %v2769_v11 }
  0xc4   : > { %1683 = vmatpush1.bf16.msra.mxu0 %v2772_v12 }
  0xc5   : > { %1901 = vmatprep.subr.bf16.mxu0 %v2777_v16 }
  0xc6   : > { %918 = vmatmul.mubr.bf16.vlgmr.msra.gmra.mrb[0].mxu1 %v719_v19 }
  0xc7   : > { %1685 = vmatmul.mubr.bf16.vlgmr.msra.gmra.mrb[0].mxu0 %v3178_v13  ;;  %v2786_v13 = vld [vmem:[%s3638_s1 + $0x634] ss:$8 sps:$4 sm:$0xff]  }
  0xc8   : > { %1902 = vmatpush1.bf16.msra.mxu0 %v2775_v20  ;;  %1933 = vmatprep.mubr.bf16.mxu0 %v1738_v6 }
  0xc9   : > { %1903 = vmatprep.subr.bf16.mxu0 %v2780_v21 }
  0xcc   : > { %1904 = vmatpush1.bf16.msra.mxu0 %v2778_v52 }
  0xcd   : > { %1905 = vmatprep.subr.bf16.mxu0 %v2783_v53 }
  0xd0   : > { %1906 = vmatpush1.bf16.msra.mxu0 %v2781_v22 }
  0xd1   : > { %1907 = vmatprep.subr.bf16.mxu0 %v2786_v13 }
  0xd4   : > { %1908 = vmatpush1.bf16.msra.mxu0 %v2784_v23 }
  0xd5   : > { %1909 = vmatprep.subr.bf16.mxu0 %v2789_v24 }
  0xd8   : > { %1910 = vmatpush1.bf16.msra.mxu0 %v2787_v25 }
  0xd9   : > { %1911 = vmatprep.subr.bf16.mxu0 %v2792_v26 }
  0xdc   : > { %1912 = vmatpush1.bf16.msra.mxu0 %v2790_v27 }
  0xdd   : > { %1913 = vmatprep.subr.bf16.mxu0 %v2795_v28 }
  0xe0   : > { %1914 = vmatpush1.bf16.msra.mxu0 %v2793_v29 }
  0xe1   : > { %1915 = vmatprep.subr.bf16.mxu0 %v2798_v30 }
  0xe4   : > { %1916 = vmatpush1.bf16.msra.mxu0 %v2796_v31 }
  0xe5   : > { %1917 = vmatprep.subr.bf16.mxu0 %v2801_v32 }
  0xe8   : > { %1918 = vmatpush1.bf16.msra.mxu0 %v2799_v33 }
  0xe9   : > { %1919 = vmatprep.subr.bf16.mxu0 %v2804_v34 }
  0xec   : > { %1920 = vmatpush1.bf16.msra.mxu0 %v2802_v35 }
  0xed   : > { %1921 = vmatprep.subr.bf16.mxu0 %v2807_v36 }
  0xf0   : > { %1922 = vmatpush1.bf16.msra.mxu0 %v2805_v37 }
  0xf1   : > { %1923 = vmatprep.subr.bf16.mxu0 %v2810_v38 }
  0xf4   : > { %1924 = vmatpush1.bf16.msra.mxu0 %v2808_v39 }
  0xf5   : > { %1925 = vmatprep.subr.bf16.mxu0 %v2813_v40 }
  0xf8   : > { %1926 = vmatpush1.bf16.msra.mxu0 %v2811_v41 }
  0xf9   : > { %1927 = vmatprep.subr.bf16.mxu0 %v2816_v42 }
  0xfc   : > { %1928 = vmatpush1.bf16.msra.mxu0 %v2814_v43 }
  0xfd   : > { %1929 = vmatprep.subr.bf16.mxu0 %v2819_v44 }
 0x100   : > { %1930 = vmatpush1.bf16.msra.mxu0 %v2817_v45 }
 0x101   : > { %1931 = vmatprep.subr.bf16.mxu0 %v2822_v46 }
 0x104   : > { %1932 = vmatpush1.bf16.msra.mxu0 %v2820_v47 }
 0x107   : > { %1934 = vmatmul.mubr.bf16.vlgmr.msra.gmra.mrb[0].mxu0 %v1735_v50 }
 0x199   : > { %v919_v51 = vpop.f32.mrb[0].mxu1 }
 0x19a   : > { %v921_v54 = vpop.f32.mrb[1].mxu1 }
 0x19b   : > { %v923_v55 = vpop.f32.mrb[2].mxu1 }
 0x19c   : > { %v925_v56 = vpop.f32.mrb[3].mxu1 }
 0x1da   : > { %v1935_v9 = vpop.f32.mrb[0].mxu0 }
 0x1db   : > { %v2454_v0 = vadd.f32 %v1935_v9, %v919_v51  ;;  %v1937_v1 = vpop.f32.mrb[1].mxu0 }
 0x1dc   : > { %v2455_v59 = vadd.f32 %v1937_v1, %v921_v54  ;;  %v1939_v2 = vpop.f32.mrb[2].mxu0 }
 0x1dd   : > { %v1960_v3 = vadd.f32 %v2454_v0, %v1953_v60  ;;  %v2456_v4 = vadd.f32 %v1939_v2, %v923_v55  ;;  %v1941_v5 = vpop.f32.mrb[3].mxu0 }
 0x1de   : > { %v1961_v7 = vadd.f32 %v2455_v59, %v1957_v63  ;;  %v2457_v10 = vadd.f32 %v1941_v5, %v925_v56 }
 0x1df   : > { %v1964_v11 = vmax.f32 %v1960_v3, 0.0  ;;  %v1962_v12 = vadd.f32 %v2456_v4, %v1953_v60 }
 0x1e0   : > { %v1965_v14 = vmax.f32 %v1961_v7, 0.0  ;;  %v1963_v15 = vadd.f32 %v2457_v10, %v1957_v63 }
 0x1e1   : > { %1968 = vst [vmem:[%s170_s21] sm:$0xff] %v1964_v11  ;;  %v1966_v16 = vmax.f32 %v1962_v12, 0.0 }
 0x1e2   : > { %1969 = vst [vmem:[%s170_s21 + $0x8] sm:$0xff] %v1965_v14  ;;  %v1967_v17 = vmax.f32 %v1963_v15, 0.0 }
 0x1e3   : > { %1970 = vst [vmem:[%s170_s21 + $0x10] sm:$0xff] %v1966_v16 }
 0x1e4   : > { %1971 = vst [vmem:[%s170_s21 + $0x18] sm:$0xff] %v1967_v17 }
 0x1e5 PF: > { %s13_s12 = sadd.s32 1, %s2829_s12  }
 0x1e6   : > { %p10_p4 = scmp.ge.s32.totalorder %s13_s12, 4  }
 0x1e8   :  { %12 = sbr.rel (!%p10_p4) target bundleno = 1 (0x1), region = 68 }

</bundles_post_ra>
